<compile_context>
chip_gen: v6e
topology: v6e:2x2x1
jax: 0.10.0
libtpu: 0.0.40
codegen_flags: <defaults>
</compile_context>

<pallas_src>
import functools

import jax
import jax.numpy as jnp
from jax.experimental import pallas as pl
from jax.experimental.pallas import tpu as pltpu

IN_DIM = 28 * 28       # 784
H1_DIM = 128
H2_DIM = 64
H2_PAD = 128           # lane-dense padded hidden width (zero columns)
OUT_DIM = 10
OUT_PAD = 128          # lane-dense padded output width (zero columns)
NEG_SLOPE = 0.01
LANE = 128


def _round_up(x, m):
    return (x + m - 1) // m * m


def _batch_dim_semantics():
    """CORE_PARALLEL on multi-TensorCore chips (v7x); plain parallel elsewhere."""
    try:
        kind = jax.devices()[0].device_kind.lower()
    except Exception:
        kind = ""
    if "v7" in kind and hasattr(pltpu, "CORE_PARALLEL"):
        return (pltpu.CORE_PARALLEL,)
    return (getattr(pltpu, "PARALLEL", "parallel"),)


_BATCH_SEMANTICS = _batch_dim_semantics()


def _leaky_relu(x, slope=NEG_SLOPE):
    # mul + max (cheaper on the VPU than cmp + mul + select); slope in (0,1).
    return jnp.maximum(x, slope * x)


def mlp_kernel(x_ref, w1_ref, b1_ref, w2_ref, b2_ref, w3_ref, b3_ref, o_ref):
    # One (TILE_B, 784) batch tile per grid step; all three matmuls and both
    # LeakyReLU activations fused.  MXU inputs may be bf16; accumulation,
    # bias add and activation stay in f32.  Output store is lane-dense 128.
    x = x_ref[...].astype(w1_ref.dtype)                                   # (T, 784)

    h1 = jnp.dot(x, w1_ref[...], preferred_element_type=jnp.float32)      # (T, 128) f32
    h1 = _leaky_relu(h1 + b1_ref[...])

    h2 = jnp.dot(h1.astype(w2_ref.dtype), w2_ref[...],
                 preferred_element_type=jnp.float32)                      # (T, 128) f32
    h2 = _leaky_relu(h2 + b2_ref[...])

    out = jnp.dot(h2.astype(w3_ref.dtype), w3_ref[...],
                  preferred_element_type=jnp.float32)                     # (T, 128) f32
    o_ref[...] = (out + b3_ref[...]).astype(o_ref.dtype)                  # unmasked 128-lane store


@functools.partial(jax.jit, static_argnames=("tile_b", "use_bf16"))
def leaky_relu_mlp(x, params, *, tile_b=2048, use_bf16=True):
    """x: (B, 1, 28, 28) or (B, 784), f32 or bf16.  Returns (B, 10) float32."""
    w1, b1, w2, b2, w3, b3 = params
    x2d = x.reshape(-1, IN_DIM)                  # == torch x.view(-1, 28*28); no copy, no cast
    B = x2d.shape[0]

    # Lane-dense hidden/output: zero-pad H2 64 -> 128 and OUT 10 -> 128.
    # Exact: zero W2 cols -> LeakyReLU(0) = 0 -> zero W3 rows contribute 0.
    w2p = jnp.zeros((H1_DIM, H2_PAD), jnp.float32).at[:, :H2_DIM].set(w2)
    b2p = jnp.zeros((1, H2_PAD), jnp.float32).at[:, :H2_DIM].set(b2)
    w3p = jnp.zeros((H2_PAD, OUT_PAD), jnp.float32).at[:H2_DIM, :OUT_DIM].set(w3)
    b3p = jnp.zeros((1, OUT_PAD), jnp.float32).at[:, :OUT_DIM].set(b3)

    w_dtype = jnp.bfloat16 if use_bf16 else jnp.float32
    out_dtype = jnp.bfloat16 if use_bf16 else jnp.float32
    w1c, w2c, w3c = (w.astype(w_dtype) for w in (w1, w2p, w3p))   # tiny, one-time casts
    b1c = b1.astype(jnp.float32)

    # Batch tile: multiple of 8 sublanes, capped at tile_b; partial last tile
    # is handled by Pallas edge masking (rows are independent), so no jnp.pad.
    TILE_B = min(_round_up(tile_b, 8), _round_up(B, 8))
    grid = (pl.cdiv(B, TILE_B),)

    # Explicit scoped-VMEM budget from the actual buffers (x tile lane-padded
    # 784 -> 896 in VMEM; everything double-buffered by BlockSpec pipelining).
    x_itemsize = x2d.dtype.itemsize
    w_itemsize = jnp.dtype(w_dtype).itemsize
    out_itemsize = jnp.dtype(out_dtype).itemsize
    est_vmem = (
        2 * TILE_B * _round_up(IN_DIM, LANE) * x_itemsize              # x tiles
        + 2 * TILE_B * OUT_PAD * out_itemsize                          # out tiles
        + 2 * (IN_DIM * H1_DIM + H1_DIM * H2_PAD + H2_PAD * OUT_PAD) * w_itemsize
        + 2 * 3 * 8 * LANE * 4                                         # biases (sublane-padded)
    )
    vmem_limit = int(min(max(est_vmem * 3 // 2 + (4 << 20), 32 << 20), 48 << 20))

    flops = 2 * B * (IN_DIM * H1_DIM + H1_DIM * H2_PAD + H2_PAD * OUT_PAD)
    weight_bytes = ((IN_DIM * H1_DIM + H1_DIM * H2_PAD + H2_PAD * OUT_PAD) * w_itemsize
                    + (H1_DIM + H2_PAD + OUT_PAD) * 4)
    bytes_accessed = (B * IN_DIM * x_itemsize
                      + weight_bytes
                      + B * OUT_PAD * out_itemsize)

    const = lambda i: (0, 0)   # weights/biases: VMEM-resident, never re-fetched

    out_padded = pl.pallas_call(
        mlp_kernel,
        out_shape=jax.ShapeDtypeStruct((B, OUT_PAD), out_dtype),
        grid=grid,
        in_specs=[
            pl.BlockSpec((TILE_B, IN_DIM), lambda i: (i, 0)),   # streamed batch tiles
            pl.BlockSpec((IN_DIM, H1_DIM), const),
            pl.BlockSpec((1, H1_DIM), const),
            pl.BlockSpec((H1_DIM, H2_PAD), const),
            pl.BlockSpec((1, H2_PAD), const),
            pl.BlockSpec((H2_PAD, OUT_PAD), const),
            pl.BlockSpec((1, OUT_PAD), const),
        ],
        out_specs=pl.BlockSpec((TILE_B, OUT_PAD), lambda i: (i, 0)),
        compiler_params=pltpu.CompilerParams(
            dimension_semantics=_BATCH_SEMANTICS,
            vmem_limit_bytes=vmem_limit),
        cost_estimate=pl.CostEstimate(
            flops=flops, transcendentals=0, bytes_accessed=bytes_accessed),
    )(x2d, w1c, b1c, w2c, b2p, w3c, b3p)

    # Only remaining wrapper pass: tiny (B,128) -> (B,10) column slice.
    return out_padded[:, :OUT_DIM].astype(jnp.float32)


def init_params(key):
    """Deterministic init mimicking torch nn.Linear (uniform +/- 1/sqrt(fan_in)).

    Weights stored as (in_features, out_features); biases as (1, out_features).
    """
    sizes = [(IN_DIM, H1_DIM), (H1_DIM, H2_DIM), (H2_DIM, OUT_DIM)]
    params = []
    for (fan_in, fan_out) in sizes:
        key, kw, kb = jax.random.split(key, 3)
        bound = 1.0 / (fan_in ** 0.5)
        w = jax.random.uniform(kw, (fan_in, fan_out), jnp.float32, -bound, bound)
        b = jax.random.uniform(kb, (1, fan_out), jnp.float32, -bound, bound)
        params += [w, b]
    return tuple(params)


def _reference(x, params):
    w1, b1, w2, b2, w3, b3 = params
    xr = x.reshape(-1, IN_DIM)
    h1 = xr @ w1 + b1
    h1 = jnp.where(h1 > 0, h1, NEG_SLOPE * h1)
    h2 = h1 @ w2 + b2
    h2 = jnp.where(h2 > 0, h2, NEG_SLOPE * h2)
    return h2 @ w3 + b3


if __name__ == "__main__":
    key = jax.random.PRNGKey(0)
    key, kx = jax.random.split(key)

    params = init_params(key)
    x = jax.random.normal(kx, (8, 1, 28, 28), jnp.float32)   # MNIST-like NCHW batch

    ref = _reference(x, params)

    # Strict f32 path
    out_f32 = jax.block_until_ready(leaky_relu_mlp(x, params, use_bf16=False))
    assert out_f32.shape == (8, OUT_DIM)
    assert jnp.allclose(out_f32, ref, atol=1e-4, rtol=1e-4), "f32 mismatch"

    # Default path: bf16 weights / bf16 MXU inputs / bf16 store, f32 accumulate
    out_bf16 = jax.block_until_ready(leaky_relu_mlp(x, params))
    assert out_bf16.shape == (8, OUT_DIM)
    assert jnp.allclose(out_bf16, ref, atol=3e-2, rtol=3e-2), "bf16 mismatch"

    print("KERNEL_OK")
</pallas_src>

<mosaic_0001>
module attributes {stable_mosaic.version = 11 : i64} {
  func.func @mlp_kernel(%arg0: i32, %arg1: memref<8x784xf32, #tpu.memory_space<vmem>>, %arg2: memref<784x128xf32, #tpu.memory_space<vmem>>, %arg3: memref<1x128xf32, #tpu.memory_space<vmem>>, %arg4: memref<128x128xf32, #tpu.memory_space<vmem>>, %arg5: memref<1x128xf32, #tpu.memory_space<vmem>>, %arg6: memref<128x128xf32, #tpu.memory_space<vmem>>, %arg7: memref<1x128xf32, #tpu.memory_space<vmem>>, %arg8: memref<8x128xf32, #tpu.memory_space<vmem>>) attributes {dimension_semantics = [#tpu.dimension_semantics<parallel>], iteration_bounds = array<i64: 1>, scalar_prefetch = 0 : i64, scratch_operands = 0 : i64, tpu.core_type = #tpu.core_type<tc>, window_params = [{transform_indices = @transform_0, window_bounds = array<i64: 8, 784>}, {pipeline_mode = #tpu.pipeline_mode<synchronous>, transform_indices = @transform_1, window_bounds = array<i64: 784, 128>}, {pipeline_mode = #tpu.pipeline_mode<synchronous>, transform_indices = @transform_2, window_bounds = array<i64: 1, 128>}, {pipeline_mode = #tpu.pipeline_mode<synchronous>, transform_indices = @transform_3, window_bounds = array<i64: 128, 128>}, {pipeline_mode = #tpu.pipeline_mode<synchronous>, transform_indices = @transform_4, window_bounds = array<i64: 1, 128>}, {pipeline_mode = #tpu.pipeline_mode<synchronous>, transform_indices = @transform_5, window_bounds = array<i64: 128, 128>}, {pipeline_mode = #tpu.pipeline_mode<synchronous>, transform_indices = @transform_6, window_bounds = array<i64: 1, 128>}, {transform_indices = @transform_7, window_bounds = array<i64: 8, 128>}]} {
    %c0 = arith.constant 0 : index
    %c0_0 = arith.constant 0 : index
    %0 = vector.load %arg1[%c0, %c0_0] : memref<8x784xf32, #tpu.memory_space<vmem>>, vector<8x784xf32>
    %c0_1 = arith.constant 0 : index
    %c0_2 = arith.constant 0 : index
    %1 = vector.load %arg2[%c0_1, %c0_2] : memref<784x128xf32, #tpu.memory_space<vmem>>, vector<784x128xf32>
    %cst = arith.constant dense<0.000000e+00> : vector<8x128xf32>
    %2 = tpu.matmul %0, %1, %cst {dimension_numbers = #tpu.dot_dimension_numbers<[1], [0], [0], [1], [0, 0, 1, 1], [], []>} : vector<8x784xf32>, vector<784x128xf32>, vector<8x128xf32> -> vector<8x128xf32>
    %c0_3 = arith.constant 0 : index
    %c0_4 = arith.constant 0 : index
    %3 = vector.load %arg3[%c0_3, %c0_4] : memref<1x128xf32, #tpu.memory_space<vmem>>, vector<1x128xf32>
    %4 = vector.broadcast %3 : vector<1x128xf32> to vector<8x128xf32>
    %5 = arith.addf %2, %4 : vector<8x128xf32>
    %cst_5 = arith.constant 0.00999999977 : f32
    %6 = vector.broadcast %cst_5 : f32 to vector<8x128xf32>
    %7 = arith.mulf %6, %5 : vector<8x128xf32>
    %8 = arith.maximumf %5, %7 : vector<8x128xf32>
    %c0_6 = arith.constant 0 : index
    %c0_7 = arith.constant 0 : index
    %9 = vector.load %arg4[%c0_6, %c0_7] : memref<128x128xf32, #tpu.memory_space<vmem>>, vector<128x128xf32>
    %cst_8 = arith.constant dense<0.000000e+00> : vector<8x128xf32>
    %10 = tpu.matmul %8, %9, %cst_8 {dimension_numbers = #tpu.dot_dimension_numbers<[1], [0], [0], [1], [0, 0, 1, 1], [], []>} : vector<8x128xf32>, vector<128x128xf32>, vector<8x128xf32> -> vector<8x128xf32>
    %c0_9 = arith.constant 0 : index
    %c0_10 = arith.constant 0 : index
    %11 = vector.load %arg5[%c0_9, %c0_10] : memref<1x128xf32, #tpu.memory_space<vmem>>, vector<1x128xf32>
    %12 = vector.broadcast %11 : vector<1x128xf32> to vector<8x128xf32>
    %13 = arith.addf %10, %12 : vector<8x128xf32>
    %cst_11 = arith.constant 0.00999999977 : f32
    %14 = vector.broadcast %cst_11 : f32 to vector<8x128xf32>
    %15 = arith.mulf %14, %13 : vector<8x128xf32>
    %16 = arith.maximumf %13, %15 : vector<8x128xf32>
    %c0_12 = arith.constant 0 : index
    %c0_13 = arith.constant 0 : index
    %17 = vector.load %arg6[%c0_12, %c0_13] : memref<128x128xf32, #tpu.memory_space<vmem>>, vector<128x128xf32>
    %cst_14 = arith.constant dense<0.000000e+00> : vector<8x128xf32>
    %18 = tpu.matmul %16, %17, %cst_14 {dimension_numbers = #tpu.dot_dimension_numbers<[1], [0], [0], [1], [0, 0, 1, 1], [], []>} : vector<8x128xf32>, vector<128x128xf32>, vector<8x128xf32> -> vector<8x128xf32>
    %c0_15 = arith.constant 0 : index
    %c0_16 = arith.constant 0 : index
    %19 = vector.load %arg7[%c0_15, %c0_16] : memref<1x128xf32, #tpu.memory_space<vmem>>, vector<1x128xf32>
    %20 = vector.broadcast %19 : vector<1x128xf32> to vector<8x128xf32>
    %21 = arith.addf %18, %20 : vector<8x128xf32>
    %c0_17 = arith.constant 0 : index
    %c0_18 = arith.constant 0 : index
    %22 = vector.load %arg8[%c0_17, %c0_18] : memref<8x128xf32, #tpu.memory_space<vmem>>, vector<8x128xf32>
    tpu.vector_store %arg8[%c0_17, %c0_18], %21 {strides = array<i32>} : memref<8x128xf32, #tpu.memory_space<vmem>>, vector<8x128xf32>,
    return
  }
  func.func @transform_0(%arg0: i32) -> (i32, i32) {
    %c0_i32 = arith.constant 0 : i32
    %c0_i32_0 = arith.constant 0 : i32
    return %arg0, %c0_i32 : i32, i32
  }
  func.func @transform_1(%arg0: i32) -> (i32, i32) {
    %c0_i32 = arith.constant 0 : i32
    %c0_i32_0 = arith.constant 0 : i32
    %c0_i32_1 = arith.constant 0 : i32
    return %c0_i32, %c0_i32_0 : i32, i32
  }
  func.func @transform_2(%arg0: i32) -> (i32, i32) {
    %c0_i32 = arith.constant 0 : i32
    %c0_i32_0 = arith.constant 0 : i32
    %c0_i32_1 = arith.constant 0 : i32
    return %c0_i32, %c0_i32_0 : i32, i32
  }
  func.func @transform_3(%arg0: i32) -> (i32, i32) {
    %c0_i32 = arith.constant 0 : i32
    %c0_i32_0 = arith.constant 0 : i32
    %c0_i32_1 = arith.constant 0 : i32
    return %c0_i32, %c0_i32_0 : i32, i32
  }
  func.func @transform_4(%arg0: i32) -> (i32, i32) {
    %c0_i32 = arith.constant 0 : i32
    %c0_i32_0 = arith.constant 0 : i32
    %c0_i32_1 = arith.constant 0 : i32
    return %c0_i32, %c0_i32_0 : i32, i32
  }
  func.func @transform_5(%arg0: i32) -> (i32, i32) {
    %c0_i32 = arith.constant 0 : i32
    %c0_i32_0 = arith.constant 0 : i32
    %c0_i32_1 = arith.constant 0 : i32
    return %c0_i32, %c0_i32_0 : i32, i32
  }
  func.func @transform_6(%arg0: i32) -> (i32, i32) {
    %c0_i32 = arith.constant 0 : i32
    %c0_i32_0 = arith.constant 0 : i32
    %c0_i32_1 = arith.constant 0 : i32
    return %c0_i32, %c0_i32_0 : i32, i32
  }
  func.func @transform_7(%arg0: i32) -> (i32, i32) {
    %c0_i32 = arith.constant 0 : i32
    %c0_i32_0 = arith.constant 0 : i32
    return %arg0, %c0_i32 : i32, i32
  }
}

</mosaic_0001>

<bundles_post_ra>
// kernel: leaky_relu_mlp.1
= control target key start
LH: loop header
LB: loop body
LE: loop exit
PB: predicated region body
PF: predicated region fallthrough
CT: control target
= control target key end

     0   :  { %s1382_s0 = inlined_call_operand.vmem [shape: f32[8,784], index: 0, kind: input, shape index: {}]   ;;  %s1383_s1 = inlined_call_operand.vmem [shape: f32[784,128], index: 1, kind: input, shape index: {}]   ;;  %s1384_s2 = inlined_call_operand.vmem [shape: f32[1,128], index: 2, kind: input, shape index: {}]   ;;  %s1385_s3 = inlined_call_operand.vmem [shape: f32[128,128], index: 3, kind: input, shape index: {}]   ;;  %s1386_s4 = inlined_call_operand.vmem [shape: f32[1,128], index: 4, kind: input, shape index: {}]   ;;  %s1387_s5 = inlined_call_operand.vmem [shape: f32[128,128], index: 5, kind: input, shape index: {}]   ;;  %s1388_s6 = inlined_call_operand.vmem [shape: f32[1,128], index: 6, kind: input, shape index: {}]   ;;  %s1389_s7 = inlined_call_operand.hbm [shape: f32[8,128], index: 7, kind: output, shape index: {}]  }
   0x1   :  { %v65_v0 = vld [vmem:[%s1383_s1 + $0xf8] sm:$0xff]  ;;  %v64_v2 = vld [vmem:[%s1383_s1 + $0xf0] sm:$0xff]  ;;  %v63_v6 = vld [vmem:[%s1383_s1 + $0xe8] sm:$0xff] }
   0x2   :  { %v49_v1 = vld [vmem:[%s1383_s1 + $0x78] sm:$0xff]  ;;  %632 = vmatprep.subr.mxu0 %v65_v0  ;;  %v48_v4 = vld [vmem:[%s1383_s1 + $0x70] sm:$0xff]  ;;  %v47_v8 = vld [vmem:[%s1383_s1 + $0x68] sm:$0xff] }
   0x3   :  { %v97_v3 = vld [vmem:[%s1383_s1 + $0x1f8] sm:$0xff]  ;;  %633 = vmatpush3.msra.mxu0 %v49_v1  ;;  %v96_v7 = vld [vmem:[%s1383_s1 + $0x1f0] sm:$0xff]  ;;  %v95_v10 = vld [vmem:[%s1383_s1 + $0x1e8] sm:$0xff] }
   0x4   :  { %v81_v5 = vld [vmem:[%s1383_s1 + $0x178] sm:$0xff]  ;;  %667 = vmatprep.subr.mxu1 %v97_v3  ;;  %634 = vmatprep.subr.mxu0 %v64_v2  ;;  %v80_v9 = vld [vmem:[%s1383_s1 + $0x170] sm:$0xff]  ;;  %v62_v11 = vld [vmem:[%s1383_s1 + $0xe0] sm:$0xff] }
   0x5   :  { %668 = vmatpush3.msra.mxu1 %v81_v5  ;;  %635 = vmatpush3.msra.mxu0 %v48_v4  ;;  %v79_v12 = vld [vmem:[%s1383_s1 + $0x168] sm:$0xff]  ;;  %v46_v13 = vld [vmem:[%s1383_s1 + $0x60] sm:$0xff]  ;;  %v61_v15 = vld [vmem:[%s1383_s1 + $0xd8] sm:$0xff] }
   0x6   :  { %669 = vmatprep.subr.mxu1 %v96_v7  ;;  %636 = vmatprep.subr.mxu0 %v63_v6  ;;  %v94_v14 = vld [vmem:[%s1383_s1 + $0x1e0] sm:$0xff]  ;;  %v45_v17 = vld [vmem:[%s1383_s1 + $0x58] sm:$0xff]  ;;  %v60_v19 = vld [vmem:[%s1383_s1 + $0xd0] sm:$0xff] }
   0x7   :  { %670 = vmatpush3.msra.mxu1 %v80_v9  ;;  %637 = vmatpush3.msra.mxu0 %v47_v8  ;;  %v78_v16 = vld [vmem:[%s1383_s1 + $0x160] sm:$0xff]  ;;  %v93_v18 = vld [vmem:[%s1383_s1 + $0x1d8] sm:$0xff]  ;;  %v44_v21 = vld [vmem:[%s1383_s1 + $0x50] sm:$0xff] }
   0x8   :  { %671 = vmatprep.subr.mxu1 %v95_v10  ;;  %638 = vmatprep.subr.mxu0 %v62_v11  ;;  %v77_v20 = vld [vmem:[%s1383_s1 + $0x158] sm:$0xff]  ;;  %v92_v22 = vld [vmem:[%s1383_s1 + $0x1d0] sm:$0xff]  ;;  %v59_v23 = vld [vmem:[%s1383_s1 + $0xc8] sm:$0xff] }
   0x9   :  { %672 = vmatpush3.msra.mxu1 %v79_v12  ;;  %639 = vmatpush3.msra.mxu0 %v46_v13  ;;  %v76_v24 = vld [vmem:[%s1383_s1 + $0x150] sm:$0xff]  ;;  %v43_v25 = vld [vmem:[%s1383_s1 + $0x48] sm:$0xff]  ;;  %v58_v27 = vld [vmem:[%s1383_s1 + $0xc0] sm:$0xff] }
   0xa   :  { %673 = vmatprep.subr.mxu1 %v94_v14  ;;  %640 = vmatprep.subr.mxu0 %v61_v15  ;;  %v91_v26 = vld [vmem:[%s1383_s1 + $0x1c8] sm:$0xff]  ;;  %v42_v29 = vld [vmem:[%s1383_s1 + $0x40] sm:$0xff]  ;;  %v57_v31 = vld [vmem:[%s1383_s1 + $0xb8] sm:$0xff] }
   0xb   :  { %674 = vmatpush3.msra.mxu1 %v78_v16  ;;  %641 = vmatpush3.msra.mxu0 %v45_v17  ;;  %v75_v28 = vld [vmem:[%s1383_s1 + $0x148] sm:$0xff]  ;;  %v90_v30 = vld [vmem:[%s1383_s1 + $0x1c0] sm:$0xff]  ;;  %v41_v33 = vld [vmem:[%s1383_s1 + $0x38] sm:$0xff] }
   0xc   :  { %675 = vmatprep.subr.mxu1 %v93_v18  ;;  %642 = vmatprep.subr.mxu0 %v60_v19  ;;  %v74_v32 = vld [vmem:[%s1383_s1 + $0x140] sm:$0xff]  ;;  %v89_v34 = vld [vmem:[%s1383_s1 + $0x1b8] sm:$0xff]  ;;  %v56_v35 = vld [vmem:[%s1383_s1 + $0xb0] sm:$0xff] }
   0xd   :  { %676 = vmatpush3.msra.mxu1 %v77_v20  ;;  %643 = vmatpush3.msra.mxu0 %v44_v21  ;;  %v73_v36 = vld [vmem:[%s1383_s1 + $0x138] sm:$0xff]  ;;  %v40_v37 = vld [vmem:[%s1383_s1 + $0x30] sm:$0xff]  ;;  %v55_v39 = vld [vmem:[%s1383_s1 + $0xa8] sm:$0xff] }
   0xe   :  { %677 = vmatprep.subr.mxu1 %v92_v22  ;;  %644 = vmatprep.subr.mxu0 %v59_v23  ;;  %v88_v38 = vld [vmem:[%s1383_s1 + $0x1b0] sm:$0xff]  ;;  %v39_v41 = vld [vmem:[%s1383_s1 + $0x28] sm:$0xff]  ;;  %v54_v43 = vld [vmem:[%s1383_s1 + $0xa0] sm:$0xff] }
   0xf   :  { %678 = vmatpush3.msra.mxu1 %v76_v24  ;;  %645 = vmatpush3.msra.mxu0 %v43_v25  ;;  %v72_v40 = vld [vmem:[%s1383_s1 + $0x130] sm:$0xff]  ;;  %v87_v42 = vld [vmem:[%s1383_s1 + $0x1a8] sm:$0xff]  ;;  %v38_v45 = vld [vmem:[%s1383_s1 + $0x20] sm:$0xff] }
  0x10   :  { %679 = vmatprep.subr.mxu1 %v91_v26  ;;  %646 = vmatprep.subr.mxu0 %v58_v27  ;;  %v71_v44 = vld [vmem:[%s1383_s1 + $0x128] sm:$0xff]  ;;  %v86_v46 = vld [vmem:[%s1383_s1 + $0x1a0] sm:$0xff]  ;;  %v53_v47 = vld [vmem:[%s1383_s1 + $0x98] sm:$0xff] }
  0x11   :  { %680 = vmatpush3.msra.mxu1 %v75_v28  ;;  %647 = vmatpush3.msra.mxu0 %v42_v29  ;;  %v70_v48 = vld [vmem:[%s1383_s1 + $0x120] sm:$0xff]  ;;  %v37_v49 = vld [vmem:[%s1383_s1 + $0x18] sm:$0xff]  ;;  %v52_v51 = vld [vmem:[%s1383_s1 + $0x90] sm:$0xff] }
  0x12   :  { %681 = vmatprep.subr.mxu1 %v90_v30  ;;  %648 = vmatprep.subr.mxu0 %v57_v31  ;;  %v85_v50 = vld [vmem:[%s1383_s1 + $0x198] sm:$0xff]  ;;  %v36_v53 = vld [vmem:[%s1383_s1 + $0x10] sm:$0xff]  ;;  %v51_v55 = vld [vmem:[%s1383_s1 + $0x88] sm:$0xff] }
  0x13   :  { %682 = vmatpush3.msra.mxu1 %v74_v32  ;;  %649 = vmatpush3.msra.mxu0 %v41_v33  ;;  %v69_v52 = vld [vmem:[%s1383_s1 + $0x118] sm:$0xff]  ;;  %v84_v54 = vld [vmem:[%s1383_s1 + $0x190] sm:$0xff]  ;;  %v35_v57 = vld [vmem:[%s1383_s1 + $0x8] sm:$0xff] }
  0x14   :  { %683 = vmatprep.subr.mxu1 %v89_v34  ;;  %650 = vmatprep.subr.mxu0 %v56_v35  ;;  %v68_v56 = vld [vmem:[%s1383_s1 + $0x110] sm:$0xff]  ;;  %v83_v58 = vld [vmem:[%s1383_s1 + $0x188] sm:$0xff]  ;;  %v50_v59 = vld [vmem:[%s1383_s1 + $0x80] sm:$0xff] }
  0x15   :  { %684 = vmatpush3.msra.mxu1 %v73_v36  ;;  %651 = vmatpush3.msra.mxu0 %v40_v37  ;;  %v28_v60 = vld [vmem:[%s1382_s0 + $0x8] sm:$0xff]  ;;  %v34_v61 = vld [vmem:[%s1383_s1] sm:$0xff]  ;;  %v129_v1 = vld [vmem:[%s1383_s1 + $0x2f8] sm:$0xff] }
  0x16   :  { %685 = vmatprep.subr.mxu1 %v88_v38  ;;  %652 = vmatprep.subr.mxu0 %v55_v39  ;;  %v67_v62 = vld [vmem:[%s1383_s1 + $0x108] sm:$0xff]  ;;  %v27_v63 = vld [vmem:[%s1382_s0] sm:$0xff]  ;;  %v30_v3 = vld [vmem:[%s1382_s0 + $0x18] sm:$0xff] }
  0x17   :  { %686 = vmatpush3.msra.mxu1 %v72_v40  ;;  %653 = vmatpush3.msra.mxu0 %v39_v41  ;;  %v82_v0 = vld [vmem:[%s1383_s1 + $0x180] sm:$0xff]  ;;  %v113_v4 = vld [vmem:[%s1383_s1 + $0x278] sm:$0xff]  ;;  %v29_v5 = vld [vmem:[%s1382_s0 + $0x10] sm:$0xff] }
  0x18   :  { %687 = vmatprep.subr.mxu1 %v87_v42  ;;  %654 = vmatprep.subr.mxu0 %v54_v43  ;;  %v66_v2 = vld [vmem:[%s1383_s1 + $0x100] sm:$0xff]  ;;  %v128_v6 = vld [vmem:[%s1383_s1 + $0x2f0] sm:$0xff]  ;;  %v32_v8 = vld [vmem:[%s1382_s0 + $0x28] sm:$0xff] }
  0x19   :  { %688 = vmatpush3.msra.mxu1 %v71_v44  ;;  %655 = vmatpush3.msra.mxu0 %v38_v45  ;;  %v112_v7 = vld [vmem:[%s1383_s1 + $0x270] sm:$0xff]  ;;  %v127_v9 = vld [vmem:[%s1383_s1 + $0x2e8] sm:$0xff] }
  0x1a   :  { %689 = vmatprep.subr.mxu1 %v86_v46  ;;  %656 = vmatprep.subr.mxu0 %v53_v47 }
  0x1b   :  { %690 = vmatpush3.msra.mxu1 %v70_v48  ;;  %657 = vmatpush3.msra.mxu0 %v37_v49 }
  0x1c   :  { %691 = vmatprep.subr.mxu1 %v85_v50  ;;  %658 = vmatprep.subr.mxu0 %v52_v51 }
  0x1d   :  { %692 = vmatpush3.msra.mxu1 %v69_v52  ;;  %659 = vmatpush3.msra.mxu0 %v36_v53 }
  0x1e   :  { %693 = vmatprep.subr.mxu1 %v84_v54  ;;  %660 = vmatprep.subr.mxu0 %v51_v55 }
  0x1f   :  { %694 = vmatpush3.msra.mxu1 %v68_v56  ;;  %661 = vmatpush3.msra.mxu0 %v35_v57 }
  0x20   :  { %695 = vmatprep.subr.mxu1 %v83_v58  ;;  %662 = vmatprep.subr.mxu0 %v50_v59 }
  0x21   :  { %207 = vmatprep.mubr.f32.mxu0 %v28_v60  ;;  %663 = vmatpush3.msra.mxu0 %v34_v61 }
  0x22   :  { %696 = vmatpush3.msra.mxu1 %v67_v62  ;;  %208 = vmatmul.mubr.f32.vlgmr.msra.gmra.mxu0 %v27_v63 }
  0x23   :  { %697 = vmatprep.subr.mxu1 %v82_v0  ;;  %702 = vmatprep.subr.mxu0 %v129_v1 }
  0x24   :  { %698 = vmatpush3.msra.mxu1 %v66_v2  ;;  %277 = vmatprep.mubr.f32.mxu1 %v30_v3 }
  0x25   :  { %703 = vmatpush3.msra.mxu0 %v113_v4 }
  0x26   :  { %12 = vsyncpa [#allocation3], 0  ;;  %278 = vmatmul.mubr.f32.vlgmr.msra.gmra.mxu1 %v29_v5  ;;  %704 = vmatprep.subr.mxu0 %v128_v6  ;;  %v111_v10 = vld [vmem:[%s1383_s1 + $0x268] sm:$0xff]  ;;  %v126_v12 = vld [vmem:[%s1383_s1 + $0x2e0] sm:$0xff]  ;;  %v876_v14 = vmov 0.0   ;;  %vm139_vm0 = vcmask 130048  }
  0x27   :  { %v131_v11 = vld [vmem:[%s1383_s1 + $0x308] sm:$0xff]  ;;  %705 = vmatpush3.msra.mxu0 %v112_v7  ;;  %347 = vmatprep.mubr.f32.mxu0 %v32_v8  ;;  %v110_v13 = vld [vmem:[%s1383_s1 + $0x260] sm:$0xff]  ;;  %v125_v16 = vld [vmem:[%s1383_s1 + $0x2d8] sm:$0xff]  ;;  %vm877_vm1 = vmmov 0   ;;  %s878_s19 = smov [#allocation2]  }
  0x28   :  { %706 = vmatprep.subr.mxu0 %v127_v9  ;;  %774 = vmatprep.subr.mxu1 %v876_v14  ;;  %v130_v15 = vld [vmem:[%s1383_s1 + $0x300] sm:$0xff]  ;;  %v109_v17 = vld [vmem:[%s1383_s1 + $0x258] sm:$0xff]  ;;  %v33_v18 = vld [vmem:[%s1382_s0 + $0x30] sm:$0xff]  ;;  %s620_s20 = sshll.u32 %s878_s19, 4  ;;  %s621_s20 = int_to_ptr.vmem [resolvable:$true] %s620_s20 }
  0x29   :  { %707 = vmatpush3.msra.mxu0 %v111_v10  ;;  %775 = vmatpush3.msra.mxu1 %v131_v11  ;;  %v124_v19 = vld [vmem:[%s1383_s1 + $0x2d0] sm:$0xff]  ;;  %v123_v21 = vld [vmem:[%s1383_s1 + $0x2c8] sm:$0xff]  ;;  %v122_v23 = vld [vmem:[%s1383_s1 + $0x2c0] sm:$0xff]  ;;  %p859_p1 = scmp.lt.s32.totalorder %s621_s20, %s621_s20 }
  0x2a   :  { %708 = vmatprep.subr.mxu0 %v126_v12  ;;  %776 = vmatprep.subr.mxu1 %v876_v14  ;;  %v108_v20 = vld [vmem:[%s1383_s1 + $0x250] sm:$0xff]  ;;  %v107_v22 = vld [vmem:[%s1383_s1 + $0x248] sm:$0xff]  ;;  %v106_v24 = vld [vmem:[%s1383_s1 + $0x240] sm:$0xff] }
  0x2b   :  { %709 = vmatpush3.msra.mxu0 %v110_v13  ;;  %777 = vmatpush3.msra.mxu1 %v130_v15  ;;  %v121_v25 = vld [vmem:[%s1383_s1 + $0x2b8] sm:$0xff]  ;;  %v120_v27 = vld [vmem:[%s1383_s1 + $0x2b0] sm:$0xff]  ;;  %v119_v29 = vld [vmem:[%s1383_s1 + $0x2a8] sm:$0xff] }
  0x2c   :  { %710 = vmatprep.subr.mxu0 %v125_v16  ;;  %778 = vmatprep.mubr.msk.f32.mxu1 %vm877_vm1, %v876_v14  ;;  %v105_v26 = vld [vmem:[%s1383_s1 + $0x238] sm:$0xff]  ;;  %v104_v28 = vld [vmem:[%s1383_s1 + $0x230] sm:$0xff]  ;;  %v103_v30 = vld [vmem:[%s1383_s1 + $0x228] sm:$0xff] }
  0x2d   :  { %711 = vmatpush3.msra.mxu0 %v109_v17  ;;  %779 = vmatmul.mubr.msk.f32.vlgmr.msra.gmra.mxu1 %vm139_vm0, %v33_v18  ;;  %v118_v31 = vld [vmem:[%s1383_s1 + $0x2a0] sm:$0xff]  ;;  %v117_v33 = vld [vmem:[%s1383_s1 + $0x298] sm:$0xff]  ;;  %v116_v35 = vld [vmem:[%s1383_s1 + $0x290] sm:$0xff] }
  0x2e   :  { %712 = vmatprep.subr.mxu0 %v124_v19  ;;  %781 = vmatprep.subr.mxu1 %v876_v14  ;;  %v102_v32 = vld [vmem:[%s1383_s1 + $0x220] sm:$0xff]  ;;  %v101_v34 = vld [vmem:[%s1383_s1 + $0x218] sm:$0xff]  ;;  %v100_v36 = vld [vmem:[%s1383_s1 + $0x210] sm:$0xff] }
  0x2f   :  { %713 = vmatpush3.msra.mxu0 %v108_v20  ;;  %813 = vmatprep.mubr.msk.f32.mxu1 %vm877_vm1, %v876_v14  ;;  %v115_v37 = vld [vmem:[%s1383_s1 + $0x288] sm:$0xff]  ;;  %v114_v39 = vld [vmem:[%s1383_s1 + $0x280] sm:$0xff]  ;;  %v440_v42 = vld [vmem:[%s1385_s3 + $0x78] sm:$0xff] }
  0x30   :  { %714 = vmatprep.subr.mxu0 %v123_v21  ;;  %v99_v38 = vld [vmem:[%s1383_s1 + $0x208] sm:$0xff]  ;;  %v98_v40 = vld [vmem:[%s1383_s1 + $0x200] sm:$0xff]  ;;  %v439_v43 = vld [vmem:[%s1385_s3 + $0x70] sm:$0xff]  ;;  %782 = vmatpush3.msra.mxu1 %v440_v42 }
  0x31   :  { %715 = vmatpush3.msra.mxu0 %v107_v22  ;;  %v31_v41 = vld [vmem:[%s1382_s0 + $0x20] sm:$0xff]  ;;  %783 = vmatprep.subr.mxu1 %v876_v14  ;;  %v438_v44 = vld [vmem:[%s1385_s3 + $0x68] sm:$0xff]  ;;  %v436_v46 = vld [vmem:[%s1385_s3 + $0x58] sm:$0xff] }
  0x32   :  { %716 = vmatprep.subr.mxu0 %v122_v23  ;;  %784 = vmatpush3.msra.mxu1 %v439_v43  ;;  %v437_v45 = vld [vmem:[%s1385_s3 + $0x60] sm:$0xff]  ;;  %v435_v47 = vld [vmem:[%s1385_s3 + $0x50] sm:$0xff]  ;;  %v434_v48 = vld [vmem:[%s1385_s3 + $0x48] sm:$0xff] }
  0x33   :  { %717 = vmatpush3.msra.mxu0 %v106_v24  ;;  %785 = vmatprep.subr.mxu1 %v876_v14  ;;  %v433_v49 = vld [vmem:[%s1385_s3 + $0x40] sm:$0xff]  ;;  %v432_v50 = vld [vmem:[%s1385_s3 + $0x38] sm:$0xff]  ;;  %v431_v51 = vld [vmem:[%s1385_s3 + $0x30] sm:$0xff] }
  0x34   :  { %718 = vmatprep.subr.mxu0 %v121_v25  ;;  %786 = vmatpush3.msra.mxu1 %v438_v44  ;;  %v430_v52 = vld [vmem:[%s1385_s3 + $0x28] sm:$0xff]  ;;  %v429_v53 = vld [vmem:[%s1385_s3 + $0x20] sm:$0xff]  ;;  %v428_v54 = vld [vmem:[%s1385_s3 + $0x18] sm:$0xff] }
  0x35   :  { %719 = vmatpush3.msra.mxu0 %v105_v26  ;;  %787 = vmatprep.subr.mxu1 %v876_v14  ;;  %v427_v55 = vld [vmem:[%s1385_s3 + $0x10] sm:$0xff]  ;;  %v426_v56 = vld [vmem:[%s1385_s3 + $0x8] sm:$0xff]  ;;  %v425_v57 = vld [vmem:[%s1385_s3] sm:$0xff] }
  0x36   :  { %720 = vmatprep.subr.mxu0 %v120_v27  ;;  %788 = vmatpush3.msra.mxu1 %v437_v45  ;;  %v535_v58 = vld [vmem:[%s1387_s5 + $0x78] sm:$0xff]  ;;  %v534_v59 = vld [vmem:[%s1387_s5 + $0x70] sm:$0xff]  ;;  %v533_v60 = vld [vmem:[%s1387_s5 + $0x68] sm:$0xff] }
  0x37   :  { %721 = vmatpush3.msra.mxu0 %v104_v28  ;;  %789 = vmatprep.subr.mxu1 %v876_v14  ;;  %v532_v61 = vld [vmem:[%s1387_s5 + $0x60] sm:$0xff]  ;;  %v531_v62 = vld [vmem:[%s1387_s5 + $0x58] sm:$0xff]  ;;  %v530_v63 = vld [vmem:[%s1387_s5 + $0x50] sm:$0xff] }
  0x38   :  { %722 = vmatprep.subr.mxu0 %v119_v29  ;;  %790 = vmatpush3.msra.mxu1 %v436_v46  ;;  %v529_v0 = vld [vmem:[%s1387_s5 + $0x48] sm:$0xff]  ;;  %v528_v1 = vld [vmem:[%s1387_s5 + $0x40] sm:$0xff]  ;;  %v527_v2 = vld [vmem:[%s1387_s5 + $0x38] sm:$0xff] }
  0x39   :  { %723 = vmatpush3.msra.mxu0 %v103_v30  ;;  %791 = vmatprep.subr.mxu1 %v876_v14  ;;  %v526_v3 = vld [vmem:[%s1387_s5 + $0x30] sm:$0xff]  ;;  %v525_v4 = vld [vmem:[%s1387_s5 + $0x28] sm:$0xff]  ;;  %v524_v5 = vld [vmem:[%s1387_s5 + $0x20] sm:$0xff] }
  0x3a   :  { %724 = vmatprep.subr.mxu0 %v118_v31  ;;  %792 = vmatpush3.msra.mxu1 %v435_v47  ;;  %v628_v13 = vld [vmem:[%s1384_s2] ss:$0 sm:$0xff]  ;;  %v523_v25 = vld [vmem:[%s1387_s5 + $0x18] sm:$0xff]  ;;  %v522_v26 = vld [vmem:[%s1387_s5 + $0x10] sm:$0xff] }
  0x3b   :  { %725 = vmatpush3.msra.mxu0 %v102_v32  ;;  %793 = vmatprep.subr.mxu1 %v876_v14  ;;  %v521_v27 = vld [vmem:[%s1387_s5 + $0x8] sm:$0xff]  ;;  %v520_v28 = vld [vmem:[%s1387_s5] sm:$0xff]  ;;  %s854_s5 = scalar_lea.vmem %s621_s20, 128 }
  0x3c   :  { %726 = vmatprep.subr.mxu0 %v117_v33  ;;  %794 = vmatpush3.msra.mxu1 %v434_v48  ;;  %v630_v29 = vld [vmem:[%s1386_s4] ss:$0 sm:$0xff]  ;;  %p855_p0 = scmp.ne.s32.totalorder %s621_s20, %s854_s5  ;;  %p860_p2 = scmp.lt.s32.totalorder %s854_s5, %s854_s5 }
  0x3d   :  { %727 = vmatpush3.msra.mxu0 %v101_v34  ;;  %795 = vmatprep.subr.mxu1 %v876_v14 }
  0x3e   :  { %728 = vmatprep.subr.mxu0 %v116_v35  ;;  %796 = vmatpush3.msra.mxu1 %v433_v49  ;;  %v631_v35 = vld [vmem:[%s1388_s6] ss:$0 sm:$0xff]  ;;  %p861_p3 = por %p860_p2, %p859_p1 }
  0x3f   :  { %729 = vmatpush3.msra.mxu0 %v100_v36  ;;  %797 = vmatprep.subr.mxu1 %v876_v14 }
  0x40   :  { %730 = vmatprep.subr.mxu0 %v115_v37  ;;  %798 = vmatpush3.msra.mxu1 %v432_v50  ;;  %p862_p4 = pnand %p861_p3, %p855_p0 }
  0x41   :  { %731 = vmatpush3.msra.mxu0 %v99_v38  ;;  %799 = vmatprep.subr.mxu1 %v876_v14 }
  0x42   :  { %732 = vmatprep.subr.mxu0 %v114_v39  ;;  %800 = vmatpush3.msra.mxu1 %v431_v51 }
  0x43   :  { %733 = vmatpush3.msra.mxu0 %v98_v40  ;;  %801 = vmatprep.subr.mxu1 %v876_v14 }
  0x44   :  { %348 = vmatmul.mubr.f32.vlgmr.msra.gmra.mxu0 %v31_v41  ;;  %816 = vmatprep.subr.mxu0 %v876_v14 }
  0x45   :  { %848 = vmatprep.mubr.msk.f32.mxu0 %vm877_vm1, %v876_v14  ;;  %802 = vmatpush3.msra.mxu1 %v430_v52 }
  0x46   :  { %803 = vmatprep.subr.mxu1 %v876_v14  ;;  %817 = vmatpush3.msra.mxu0 %v535_v58 }
  0x47   :  { %804 = vmatpush3.msra.mxu1 %v429_v53  ;;  %818 = vmatprep.subr.mxu0 %v876_v14 }
  0x48   :  { %805 = vmatprep.subr.mxu1 %v876_v14  ;;  %819 = vmatpush3.msra.mxu0 %v534_v59 }
  0x49   :  { %806 = vmatpush3.msra.mxu1 %v428_v54  ;;  %820 = vmatprep.subr.mxu0 %v876_v14 }
  0x4a   :  { %807 = vmatprep.subr.mxu1 %v876_v14  ;;  %821 = vmatpush3.msra.mxu0 %v533_v60 }
  0x4b   :  { %808 = vmatpush3.msra.mxu1 %v427_v55  ;;  %822 = vmatprep.subr.mxu0 %v876_v14 }
  0x4c   :  { %809 = vmatprep.subr.mxu1 %v876_v14  ;;  %823 = vmatpush3.msra.mxu0 %v532_v61 }
  0x4d   :  { %810 = vmatpush3.msra.mxu1 %v426_v56  ;;  %824 = vmatprep.subr.mxu0 %v876_v14 }
  0x4e   :  { %811 = vmatprep.subr.mxu1 %v876_v14  ;;  %825 = vmatpush3.msra.mxu0 %v531_v62 }
  0x4f   :  { %812 = vmatpush3.msra.mxu1 %v425_v57  ;;  %826 = vmatprep.subr.mxu0 %v876_v14 }
  0x50   :  { %827 = vmatpush3.msra.mxu0 %v530_v63 }
  0x51   :  { %828 = vmatprep.subr.mxu0 %v876_v14 }
  0x52   :  { %829 = vmatpush3.msra.mxu0 %v529_v0 }
  0x53   :  { %830 = vmatprep.subr.mxu0 %v876_v14 }
  0x54   :  { %831 = vmatpush3.msra.mxu0 %v528_v1 }
  0x55   :  { %832 = vmatprep.subr.mxu0 %v876_v14 }
  0x56   :  { %833 = vmatpush3.msra.mxu0 %v527_v2 }
  0x57   :  { %834 = vmatprep.subr.mxu0 %v876_v14 }
  0x58   :  { %835 = vmatpush3.msra.mxu0 %v526_v3 }
  0x59   :  { %836 = vmatprep.subr.mxu0 %v876_v14 }
  0x5a   :  { %837 = vmatpush3.msra.mxu0 %v525_v4 }
  0x5b   :  { %838 = vmatprep.subr.mxu0 %v876_v14 }
  0x5c   :  { %839 = vmatpush3.msra.mxu0 %v524_v5 }
  0x5d   :  { %840 = vmatprep.subr.mxu0 %v876_v14 }
  0x5e   :  { %841 = vmatpush3.msra.mxu0 %v523_v25 }
  0x5f   :  { %842 = vmatprep.subr.mxu0 %v876_v14 }
  0x60   :  { %843 = vmatpush3.msra.mxu0 %v522_v26 }
  0x61   :  { %844 = vmatprep.subr.mxu0 %v876_v14 }
  0x62   :  { %845 = vmatpush3.msra.mxu0 %v521_v27 }
  0x63   :  { %846 = vmatprep.subr.mxu0 %v876_v14 }
  0x64   :  { %847 = vmatpush3.msra.mxu0 %v520_v28 }
  0xe2   :  { %v664_v10 = vpop.f32.mrf.mxu0 }
  0xe4   :  { %v665_v11 = vpop.f32.mrf.mxu0 }
  0xe5   :  { %v666_v12 = vadd.f32 %v665_v11, %v664_v10 }
  0xe6   :  { %v699_v6 = vpop.f32.mrf.mxu1 }
  0xe7   :  { %v210_v15 = vadd.f32 %v666_v12, %v628_v13 }
  0xe8   :  { %v700_v7 = vpop.f32.mrf.mxu1 }
  0xe9   :  { %v701_v16 = vadd.f32 %v700_v7, %v699_v6 }
  0xeb   :  { %v280_v19 = vadd.f32 %v701_v16, %v210_v15 }
  0xed   :  { %v419_v8 = vpop.f32.mrf.mxu1 }
  0xef   :  { %v780_v9 = vpop.f32.mrf.mxu1 }
 0x104   :  { %v734_v17 = vpop.f32.mrf.mxu0 }
 0x106   :  { %v735_v18 = vpop.f32.mrf.mxu0 }
 0x107   :  { %v736_v20 = vadd.f32 %v735_v18, %v734_v17 }
 0x109   :  { %v350_v21 = vadd.f32 %v736_v20, %v280_v19 }
 0x10b   :  { %v420_v22 = vadd.f32 %v419_v8, %v350_v21 }
 0x10d   :  { %v423_v23 = vmul.f32 0.01, %v420_v22 }
 0x10f   :  { %v424_v24 = vmax.f32 %v420_v22, %v423_v23 }
 0x111   :  { %814 = vmatmul.mubr.f32.vlgmr.msra.gmra.mxu1 %v424_v24 }
 0x1d1   :  { %v514_v30 = vpop.f32.mrf.mxu1 }
 0x1d2   :  { %v515_v31 = vadd.f32 %v630_v29, %v514_v30 }
 0x1d3   :  { %v815_v32 = vpop.f32.mrf.mxu1 }
 0x1d4   :  { %v518_v33 = vmul.f32 0.01, %v515_v31 }
 0x1d6   :  { %v519_v34 = vmax.f32 %v515_v31, %v518_v33 }
 0x1d8   :  { %849 = vmatmul.mubr.f32.vlgmr.msra.gmra.mxu0 %v519_v34 }
 0x298   :  { %v609_v14 = vpop.f32.mrf.mxu0 }
 0x299   :  { %v610_v36 = vadd.f32 %v631_v35, %v609_v14 }
 0x29a   :  { %v850_v37 = vpop.f32.mrf.mxu0 }
 0x29b   :  { %613 = vst [vmem:[#allocation2] sm:$0xff] %v610_v36 }
 0x29c   :  { %865 = shalt.err (!%p862_p4)
}
 0x29d   :  { %623 = dma.vmem_to_hbm [thread:$0]  %s621_s20, 128, %s1389_s7, [#allocation3]  }
 0x29e   :  { %874 = dma.done.wait [#allocation3], 128  }
 0x29f   :  { %875 = vsyncadd [#allocation3], 4294967168 }
 0x2a0   :  { %627 = vsyncpa [#allocation3], 1 }

</bundles_post_ra>
